<compile_context>
chip_gen: v7x
topology: tpu7x:2x2x1
jax: 0.10.0
libtpu: 0.0.40
codegen_flags: <defaults>
</compile_context>

<pallas_src>
import functools

import jax
import jax.numpy as jnp
from jax import lax
from jax.experimental import pallas as pl
from jax.experimental.pallas import tpu as pltpu


# ---------------------------------------------------------------------------
# Fused path: one grid step per channel, whole channel resident in VMEM.
# ---------------------------------------------------------------------------
def _fused_kernel(x_ref, o_ref):
    xf = x_ref[...].astype(jnp.float32)                     # (1, R, L)
    lo = xf.min(axis=2, keepdims=True).min(axis=1, keepdims=True)   # (1,1,1)
    hi = xf.max(axis=2, keepdims=True).max(axis=1, keepdims=True)
    # min/max commute with the monotone floor(x*255) -> quantize the extrema.
    qlo = jnp.floor(lo * 255.0)
    qhi = jnp.floor(hi * 255.0)
    valid = qhi > qlo
    scale = jnp.where(valid, 255.0 / jnp.maximum(qhi - qlo, 1.0), 1.0)
    base = jnp.where(valid, qlo, 0.0)
    q = jnp.floor(xf * 255.0)
    y = jnp.clip(jnp.floor((q - base) * scale), 0.0, 255.0)
    o_ref[...] = (y * (1.0 / 255.0)).astype(o_ref.dtype)


def _autocontrast_fused(x2):
    """x2: (C, R, L) per-channel view. One read + one write of HBM total."""
    C, R, L = x2.shape
    return pl.pallas_call(
        _fused_kernel,
        out_shape=jax.ShapeDtypeStruct((C, R, L), x2.dtype),
        grid=(C,),
        in_specs=[pl.BlockSpec((1, R, L), lambda c: (c, 0, 0))],
        out_specs=pl.BlockSpec((1, R, L), lambda c: (c, 0, 0)),
        compiler_params=pltpu.CompilerParams(
            dimension_semantics=("parallel",),          # channels -> megacore
            vmem_limit_bytes=32 * 1024 * 1024),
    )(x2)


# ---------------------------------------------------------------------------
# Streaming fallback (images too large to keep a channel resident in VMEM).
# ---------------------------------------------------------------------------
def _minmax_kernel(x_ref, lo_ref, hi_ref, *, n, tile):
    h = pl.program_id(0)                     # size-2 "parallel" axis (v7x TCs)
    i = pl.program_id(1)                     # reduction axis over lane tiles
    g = h * pl.num_programs(1) + i           # global tile index
    xf = x_ref[...].astype(jnp.float32)      # (C, tile)
    # Mask the ragged last tile (and fully-out-of-range tiles of half 1).
    rem = n - g * tile
    lane = lax.broadcasted_iota(jnp.int32, xf.shape, dimension=1)
    mask = lane < rem
    tile_lo = jnp.min(jnp.where(mask, xf, jnp.inf), axis=1, keepdims=True)
    tile_hi = jnp.max(jnp.where(mask, xf, -jnp.inf), axis=1, keepdims=True)

    @pl.when(i == 0)
    def _():
        lo_ref[...] = jnp.broadcast_to(tile_lo, lo_ref.shape)
        hi_ref[...] = jnp.broadcast_to(tile_hi, hi_ref.shape)

    @pl.when(i != 0)
    def _():
        lo_ref[...] = jnp.minimum(lo_ref[...], tile_lo)
        hi_ref[...] = jnp.maximum(hi_ref[...], tile_hi)


def _remap_kernel(x_ref, base_ref, scale_ref, o_ref):
    q = jnp.floor(x_ref[...].astype(jnp.float32) * 255.0)
    y = jnp.clip(jnp.floor((q - base_ref[...]) * scale_ref[...]), 0.0, 255.0)
    o_ref[...] = (y * (1.0 / 255.0)).astype(o_ref.dtype)


def _autocontrast_streaming(x, tile):
    C, H, W = x.shape
    n = H * W
    x2 = x.reshape(C, n)                     # free (row-major) view
    T = pl.cdiv(n, tile)
    T2 = pl.cdiv(T, 2)

    lo_p, hi_p = pl.pallas_call(
        functools.partial(_minmax_kernel, n=n, tile=tile),
        out_shape=(jax.ShapeDtypeStruct((2, C, 128), jnp.float32),
                   jax.ShapeDtypeStruct((2, C, 128), jnp.float32)),
        grid=(2, T2),
        in_specs=[pl.BlockSpec(
            (C, tile), lambda h, i: (0, jnp.minimum(h * T2 + i, T - 1)))],
        out_specs=(pl.BlockSpec((1, C, 128), lambda h, i: (h, 0, 0)),
                   pl.BlockSpec((1, C, 128), lambda h, i: (h, 0, 0))),
        compiler_params=pltpu.CompilerParams(
            dimension_semantics=("parallel", "arbitrary"),
            vmem_limit_bytes=32 * 1024 * 1024),
    )(x2)

    # Combine the two per-core partials and hoist scale/base out of the kernel.
    lo = jnp.min(lo_p, axis=(0, 2))
    hi = jnp.max(hi_p, axis=(0, 2))
    qlo = jnp.floor(lo * 255.0)
    qhi = jnp.floor(hi * 255.0)
    valid = qhi > qlo
    scale = jnp.where(valid, 255.0 / jnp.maximum(qhi - qlo, 1.0), 1.0)
    base = jnp.where(valid, qlo, 0.0)
    scale = scale.reshape(C, 1).astype(jnp.float32)
    base = base.reshape(C, 1).astype(jnp.float32)

    out = pl.pallas_call(
        _remap_kernel,
        out_shape=jax.ShapeDtypeStruct((C, n), x.dtype),
        grid=(T,),
        in_specs=[pl.BlockSpec((C, tile), lambda i: (0, i)),
                  pl.BlockSpec((C, 1), lambda i: (0, 0)),
                  pl.BlockSpec((C, 1), lambda i: (0, 0))],
        out_specs=pl.BlockSpec((C, tile), lambda i: (0, i)),
        compiler_params=pltpu.CompilerParams(
            dimension_semantics=("parallel",),
            vmem_limit_bytes=32 * 1024 * 1024),
    )(x2, base, scale)
    return out.reshape(C, H, W)


# ---------------------------------------------------------------------------
# Dispatcher + module wrapper
# ---------------------------------------------------------------------------
def _round_up(v, m):
    return (v + m - 1) // m * m


_FUSED_CHANNEL_BYTES = 3 * 1024 * 1024    # padded per-channel f32 VMEM budget
_STREAM_TILE_LANES = 32768                # ~1 MiB padded per streaming block


def _autocontrast_chw(x, *, force_streaming=False, stream_tile=None):
    C, H, W = x.shape
    n = H * W

    # Lane-dense per-channel view when it is a free reshape.
    if W % 128 == 0:
        view, R, L = x, H, W
    elif n % 128 == 0:
        view, R, L = x.reshape(C, n // 128, 128), n // 128, 128
    else:
        view, R, L = x, H, W

    fits = _round_up(R, 8) * _round_up(L, 128) * 4 <= _FUSED_CHANNEL_BYTES
    can_stream = n >= 128
    if fits and not (force_streaming and can_stream):
        return _autocontrast_fused(view).reshape(C, H, W)

    tile = _STREAM_TILE_LANES if stream_tile is None else stream_tile
    tile = max(128, min(tile, (n // 128) * 128))
    return _autocontrast_streaming(x, tile)


class AutoContrast:
    """JAX/Pallas port of the PyTorch AutoContrast module (cutoff=0)."""

    def __init__(self, p: float = 0.5):
        self.p = p

    def __call__(self, x, key):
        # Torch: `if random.random() > p: return tensor` -> apply iff u <= p.
        # TODO(synk): host `random.random()` replaced by an explicit JAX key.
        apply = jax.random.uniform(key) <= self.p
        return lax.cond(apply, lambda t: _autocontrast_chw(t), lambda t: t, x)


# ---------------------------------------------------------------------------
# Self-test
# ---------------------------------------------------------------------------
if __name__ == "__main__":
    import numpy as np

    def ref_autocontrast(x_np):
        # PIL ImageOps.autocontrast semantics, with the same f32 quantization
        # (img*255 -> uint8 truncation) the kernel uses.
        x32 = np.asarray(x_np, dtype=np.float32)
        q = np.floor(x32 * np.float32(255.0)).astype(np.float64)
        out = np.empty_like(q)
        for c in range(q.shape[0]):
            lo_c, hi_c = q[c].min(), q[c].max()
            if hi_c <= lo_c:
                out[c] = q[c]                         # identity LUT (uint8 round-trip)
            else:
                s = 255.0 / (hi_c - lo_c)
                out[c] = np.clip(np.floor((q[c] - lo_c) * s), 0.0, 255.0)
        return out / 255.0

    tol = 1.0 / 255.0 + 1e-6
    key = jax.random.PRNGKey(0)
    k1, k2, k_aug = jax.random.split(key, 3)

    # Fused path: small CHW image with one constant (degenerate) channel.
    x1 = jax.random.uniform(k1, (4, 16, 16), dtype=jnp.float32)
    x1 = x1.at[0].set(0.37)
    out1 = jax.block_until_ready(_autocontrast_chw(x1))
    assert out1.shape == x1.shape and out1.dtype == x1.dtype
    err1 = np.max(np.abs(np.asarray(out1, np.float64) - ref_autocontrast(np.asarray(x1))))
    assert err1 <= tol, f"fused path max abs err {err1}"

    # Streaming fallback: forced small tile so the last block is ragged.
    x2 = jax.random.uniform(k2, (3, 96, 100), dtype=jnp.float32)
    out2 = jax.block_until_ready(
        _autocontrast_chw(x2, force_streaming=True, stream_tile=1024))
    err2 = np.max(np.abs(np.asarray(out2, np.float64) - ref_autocontrast(np.asarray(x2))))
    assert err2 <= tol, f"streaming path max abs err {err2}"

    # Probability gate (module interface).
    module = AutoContrast(p=0.5)
    out3 = jax.block_until_ready(module(x1, k_aug))
    applied = bool(jax.random.uniform(k_aug) <= module.p)   # same key -> same draw
    ref3 = ref_autocontrast(np.asarray(x1)) if applied else np.asarray(x1, np.float64)
    err3 = np.max(np.abs(np.asarray(out3, np.float64) - ref3))
    assert err3 <= tol, f"module gate max abs err {err3}"

    print("KERNEL_OK")
</pallas_src>

<mosaic_0001>
module attributes {stable_mosaic.version = 11 : i64} {
  func.func @_fused_kernel(%arg0: i32, %arg1: memref<1x2x128xf32, #tpu.memory_space<vmem>>, %arg2: memref<1x2x128xf32, #tpu.memory_space<vmem>>) attributes {dimension_semantics = [#tpu.dimension_semantics<parallel>], iteration_bounds = array<i64: 4>, scalar_prefetch = 0 : i64, scratch_operands = 0 : i64, tpu.core_type = #tpu.core_type<tc>, window_params = [{transform_indices = @transform_0, window_bounds = array<i64: 1, 2, 128>}, {transform_indices = @transform_1, window_bounds = array<i64: 1, 2, 128>}]} {
    %c0 = arith.constant 0 : index
    %c0_0 = arith.constant 0 : index
    %c0_1 = arith.constant 0 : index
    %0 = vector.load %arg1[%c0, %c0_0, %c0_1] : memref<1x2x128xf32, #tpu.memory_space<vmem>>, vector<1x2x128xf32>
    %cst = arith.constant dense<0x7F800000> : vector<1x2xf32>
    %1 = vector.multi_reduction <minimumf>, %0, %cst [2] : vector<1x2x128xf32> to vector<1x2xf32>
    %2 = vector.shape_cast %1 : vector<1x2xf32> to vector<1x2x1xf32>
    %cst_2 = arith.constant dense<0x7F800000> : vector<1x1xf32>
    %3 = vector.multi_reduction <minimumf>, %2, %cst_2 [1] : vector<1x2x1xf32> to vector<1x1xf32>
    %4 = vector.shape_cast %3 : vector<1x1xf32> to vector<1x1x1xf32>
    %cst_3 = arith.constant dense<0xFF800000> : vector<1x2xf32>
    %5 = vector.multi_reduction <maximumf>, %0, %cst_3 [2] : vector<1x2x128xf32> to vector<1x2xf32>
    %6 = vector.shape_cast %5 : vector<1x2xf32> to vector<1x2x1xf32>
    %cst_4 = arith.constant dense<0xFF800000> : vector<1x1xf32>
    %7 = vector.multi_reduction <maximumf>, %6, %cst_4 [1] : vector<1x2x1xf32> to vector<1x1xf32>
    %8 = vector.shape_cast %7 : vector<1x1xf32> to vector<1x1x1xf32>
    %cst_5 = arith.constant 2.550000e+02 : f32
    %9 = vector.broadcast %cst_5 : f32 to vector<1x1x1xf32>
    %10 = arith.mulf %4, %9 : vector<1x1x1xf32>
    %11 = math.floor %10 : vector<1x1x1xf32>
    %cst_6 = arith.constant 2.550000e+02 : f32
    %12 = vector.broadcast %cst_6 : f32 to vector<1x1x1xf32>
    %13 = arith.mulf %8, %12 : vector<1x1x1xf32>
    %14 = math.floor %13 : vector<1x1x1xf32>
    %15 = arith.cmpf ogt, %14, %11 : vector<1x1x1xf32>
    %16 = arith.subf %14, %11 : vector<1x1x1xf32>
    %cst_7 = arith.constant 1.000000e+00 : f32
    %17 = vector.broadcast %cst_7 : f32 to vector<1x1x1xf32>
    %18 = arith.maximumf %16, %17 : vector<1x1x1xf32>
    %cst_8 = arith.constant 2.550000e+02 : f32
    %19 = vector.broadcast %cst_8 : f32 to vector<1x1x1xf32>
    %20 = arith.divf %19, %18 : vector<1x1x1xf32>
    %cst_9 = arith.constant 1.000000e+00 : f32
    %21 = vector.broadcast %cst_9 : f32 to vector<1x1x1xf32>
    %22 = arith.select %15, %20, %21 : vector<1x1x1xi1>, vector<1x1x1xf32>
    %cst_10 = arith.constant 0.000000e+00 : f32
    %23 = vector.broadcast %cst_10 : f32 to vector<1x1x1xf32>
    %24 = arith.select %15, %11, %23 : vector<1x1x1xi1>, vector<1x1x1xf32>
    %cst_11 = arith.constant 2.550000e+02 : f32
    %25 = vector.broadcast %cst_11 : f32 to vector<1x2x128xf32>
    %26 = arith.mulf %0, %25 : vector<1x2x128xf32>
    %27 = math.floor %26 : vector<1x2x128xf32>
    %28 = vector.broadcast %24 : vector<1x1x1xf32> to vector<1x2x128xf32>
    %29 = arith.subf %27, %28 : vector<1x2x128xf32>
    %30 = vector.broadcast %22 : vector<1x1x1xf32> to vector<1x2x128xf32>
    %31 = arith.mulf %29, %30 : vector<1x2x128xf32>
    %32 = math.floor %31 : vector<1x2x128xf32>
    %cst_12 = arith.constant 0.000000e+00 : f32
    %cst_13 = arith.constant 2.550000e+02 : f32
    %33 = vector.broadcast %cst_12 : f32 to vector<1x2x128xf32>
    %34 = arith.maximumf %33, %32 : vector<1x2x128xf32>
    %35 = vector.broadcast %cst_13 : f32 to vector<1x2x128xf32>
    %36 = arith.minimumf %35, %34 : vector<1x2x128xf32>
    %cst_14 = arith.constant 0.00392156886 : f32
    %37 = vector.broadcast %cst_14 : f32 to vector<1x2x128xf32>
    %38 = arith.mulf %36, %37 : vector<1x2x128xf32>
    %c0_15 = arith.constant 0 : index
    %c0_16 = arith.constant 0 : index
    %c0_17 = arith.constant 0 : index
    %39 = vector.load %arg2[%c0_15, %c0_16, %c0_17] : memref<1x2x128xf32, #tpu.memory_space<vmem>>, vector<1x2x128xf32>
    tpu.vector_store %arg2[%c0_15, %c0_16, %c0_17], %38 {strides = array<i32>} : memref<1x2x128xf32, #tpu.memory_space<vmem>>, vector<1x2x128xf32>,
    return
  }
  func.func @transform_0(%arg0: i32) -> (i32, i32, i32) {
    %c0_i32 = arith.constant 0 : i32
    %c0_i32_0 = arith.constant 0 : i32
    %c0_i32_1 = arith.constant 0 : i32
    return %arg0, %c0_i32, %c0_i32_0 : i32, i32, i32
  }
  func.func @transform_1(%arg0: i32) -> (i32, i32, i32) {
    %c0_i32 = arith.constant 0 : i32
    %c0_i32_0 = arith.constant 0 : i32
    %c0_i32_1 = arith.constant 0 : i32
    return %arg0, %c0_i32, %c0_i32_0 : i32, i32, i32
  }
}

</mosaic_0001>

<bundles_post_ra>
// kernel: tpu_custom_call.1
= control target key start
LH: loop header
LB: loop body
LE: loop exit
PB: predicated region body
PF: predicated region fallthrough
CT: control target
= control target key end

     0   :  { %6 = vsyncpa [#allocation3], 0  ;;  %s591_s0 = inlined_call_operand.hbm [shape: f32[4,2,128], index: 0, kind: input, shape index: {}]   ;;  %s592_s1 = inlined_call_operand.hbm [shape: f32[4,2,128], index: 1, kind: output, shape index: {}]  }
   0x1   :  { %8 = vsyncpa [#allocation3 + $0x1], 0 }
   0x2   :  { %9 = vsyncpa [#allocation4], 0 }
   0x3   :  { %11 = vsyncpa [#allocation4 + $0x1], 0  ;;  %s428_s6 = smov 0   ;;  %s430_s7 = smov 0  }
   0x4   :  { %s432_s8 = smov 0   ;;  %s434_s9 = smov 0  }
   0x5 LB: > { %s449_s10 = sadd.s32 4294967295, %s414_s9   ;;  %s258_s11 = sadd.s32 4294967294, %s414_s9   ;;  %s414_s9 = sphi %s434_s9, %s606_s9   ;;  %s410_s8 = sphi %s432_s8, %s605_s8   ;;  %s406_s7 = sphi %s430_s7, %s604_s7   ;;  %s402_s6 = sphi %s428_s6, %s603_s6  }
   0x6   : > { %s453_s12 = sadd.s32 1, %s414_s9   ;;  %s24_s13 = sadd.s32 1, %s410_s8 }
   0x7   : > { %s21_s14 = ssub.s32 %s414_s9, %s453_s12  ;;  %p31_p0 = scmp.ne.s32.totalorder %s410_s8, %s406_s7 }
   0x8   : > { %p22_p1 = scmp.eq.s32.totalorder %s21_s14, 0  ;;  %p32_p2 = scmp.eq.s32.totalorder %s414_s9, 0 }
   0x9   : > { %p37_p3 = scmp.ne.s32.totalorder %s406_s7, %s402_s6  ;;  %p38_p4 = scmp.eq.s32.totalorder %s449_s10, 0 }
   0xa   : > { %s465_s15 = scalar_select %p22_p1, %s410_s8, %s24_s13  }
   0xb   : > { %p467_p5 = por %p32_p2, %p31_p0  ;;  %p471_p6 = por %p38_p4, %p37_p3 }
   0xc   : > { %p61_p7 = scmp.eq.s32.totalorder %s449_s10, 3  ;;  %p67_p8 = scmp.eq.s32.totalorder %s258_s11, 3 }
   0xd   : > { %p282_p9 = scmp.lt.s32.totalorder %s414_s9, 4  ;;  %s87_s20 = sand.u32 1, %s410_s8  }
   0xe   : > { %p477_p10 = por %p61_p7, %p31_p0  ;;  %p481_p11 = por %p67_p8, %p37_p3 }
   0xf   : > { %s262_s21 = sshll.u32 %s414_s9, 5  ;;  %s261_s22 = sshll.u32 %s87_s20, 1 }
  0x10   : > { %s596_s18 = scalar_select %p477_p10, 1, 0 }
  0x11   : > { %s597_s19 = scalar_select %p481_p11, 1, 0 }
  0x12   : > { %s490_s25 = scalar_lea.hbm %s591_s0, %s262_s21  ;;  %s91_s26 = scalar_lea.vmem [#allocation2], %s261_s22 }
  0x13   : > { %s98_s27 = sshll.u32 %s91_s26, 4  ;;  %p494_p12 = pnand %p282_p9, %p467_p5  ;;  %s498_s27 = int_to_ptr.vmem [resolvable:$true] %s98_s27 }
  0x14   : > { %s88_s29 = scalar_lea.sflag [#allocation3], %s87_s20  ;;  %s318_s30 = scalar_lea.hbm %s490_s25, 32 }
  0x15   : > { %p319_p1 = scmp.ne.s32.totalorder %s490_s25, %s318_s30  ;;  %p320_p2 = pneg %p494_p12 }
  0x16   : > { %s323_s4 = scalar_lea.hbm %s591_s0, 128  ;;  %p324_p5 = scmp.lt.u32.totalorder %s490_s25, %s591_s0 }
  0x17   : > { %p321_p3 = pnand %p320_p2, %p319_p1  ;;  %p325_p7 = scmp.lt.u32.totalorder %s323_s4, %s318_s30 }
  0x18   : > { %p327_p9 = scmp.lt.u32.totalorder %s318_s30, %s490_s25 }
  0x19   : > { %p322_p4 = pneg %p321_p3  ;;  %p326_p8 = por %p325_p7, %p324_p5 }
  0x1b   : > { %p328_p13 = por %p327_p9, %p326_p8 }
  0x1d   : > { %p329_p0 = pnand %p328_p13, %p322_p4 }
  0x1f   : > { %332 = shalt.err (!%p329_p0)
}
  0x20   : > { %s333_s13 = scalar_lea.vmem %s498_s27, 32  ;;  %s416_s14 = smov [#allocation2]  }
  0x21   : > { %p334_p1 = scmp.ne.s32.totalorder %s498_s27, %s333_s13  ;;  %s338_s16 = sshll.u32 %s416_s14, 4  ;;  %s339_s16 = int_to_ptr.vmem [resolvable:$false] %s338_s16 }
  0x22   : > { %s340_s20 = scalar_lea.vmem %s339_s16, 64  ;;  %p341_p10 = scmp.lt.s32.totalorder %s498_s27, %s339_s16 }
  0x23   : > { %p336_p3 = pnand %p334_p1, %p320_p2  ;;  %p342_p5 = scmp.lt.s32.totalorder %s340_s20, %s333_s13 }
  0x25   : > { %p337_p11 = pneg %p336_p3  ;;  %p343_p7 = por %p342_p5, %p341_p10 }
  0x27   : > { %p344_p8 = pnand %p343_p7, %p337_p11 }
  0x29   : > { %347 = shalt.err (!%p344_p8)
}
  0x2a   : > { %277 = dma.hbm_to_vmem [thread:$0]  (!%p494_p12), %s490_s25, 32, %s498_s27, %s88_s29  }
  0x2b   : > { %p599_p13 = scmp.lt.s32.totalorder %s414_s9, 5  ;;  %p600_p0 = scmp.ge.s32.totalorder %s414_s9, 1 }
  0x2d   : > { %p104_p2 = pnand %p600_p0, %p599_p13 }
  0x2e   : > { %s532_s21 = sand.u32 (!%p104_p2), 1, %s406_s7  }
  0x2f   : > { %107 = sbr.rel (%p104_p2) target bundleno = 262 (0x106), region = 24  ;;  %s264_s22 = sshll.u32 (!%p104_p2), %s532_s21, 1 }
  0x30   : > { %s110_s23 = scalar_lea.sflag (!%p104_p2), [#allocation3], %s532_s21  ;;  %s113_s24 = scalar_lea.vmem (!%p104_p2), [#allocation2], %s264_s22 }
  0x36   : > { %393 = dma.done.wait (%p471_p6), %s110_s23, 32  }
  0x37   : > { %395 = vsyncadd (%p471_p6), %s110_s23, 4294967264  ;;  %vm133_vm0 = vcmask 1041408   ;;  %v132_v0 = vld [vmem:[%s113_s24] sm:$0x3]  ;;  %s267_s17 = sshll.u32 %s449_s10, 5  ;;  %s131_s25 = scalar_lea.vmem [#allocation5], %s264_s22 }
  0x38   : > { %v134_v1 = vsel %vm133_vm0, %v132_v0, inf  ;;  %v144_v2 = vsel %vm133_vm0, %v132_v0, -inf  ;;  %v165_v25 = vmul.f32 255.0, %v132_v0  ;;  %s188_s26 = sshll.u32 %s131_s25, 4  ;;  %s548_s29 = scalar_lea.hbm %s592_s1, %s267_s17  ;;  %s550_s26 = int_to_ptr.vmem [resolvable:$true] %s188_s26 }
  0x39   : > { %135 = vmin.xlane.f32.xlu0 %v134_v1  ;;  %s175_s30 = scalar_lea.sflag [#allocation4], %s532_s21  ;;  %s348_s2 = scalar_lea.vmem %s550_s26, 32 }
  0x3a   : > { %v166_v26 = vfloor.f32 %v165_v25  ;;  %p349_p6 = scmp.ne.s32.totalorder %s550_s26, %s348_s2  ;;  %p601_p10 = scmp.ne.s32.totalorder %s596_s18, 0 }
  0x3b   : > { %s417_s10 = smov [#allocation5]  }
  0x3c   : > { %p350_p11 = pnand %p349_p6, %p601_p10  ;;  %s352_s3 = sshll.u32 %s417_s10, 4  ;;  %s353_s3 = int_to_ptr.vmem [resolvable:$false] %s352_s3 }
  0x3d   : > { %145 = vmax.xlane.f32.xlu0 %v144_v2  ;;  %s354_s4 = scalar_lea.vmem %s353_s3, 64  ;;  %p355_p4 = scmp.lt.s32.totalorder %s550_s26, %s353_s3 }
  0x3e   : > { %p351_p12 = pneg %p350_p11  ;;  %p356_p9 = scmp.lt.s32.totalorder %s354_s4, %s348_s2 }
  0x40   : > { %p357_p1 = por %p356_p9, %p355_p4 }
  0x42   : > { %p358_p3 = pnand %p357_p1, %p351_p12 }
  0xc6   : > { %v136_v3 = vpop.xlane.xlu0 %135 }
  0xc7   : > { %v137_v4 = vsel %vm133_vm0, %v136_v3, inf }
  0xc8   : > { %v138_v5 = vrot.slane %v137_v4, 4 }
  0xca   : > { %v139_v6 = vmin.f32 %v137_v4, %v138_v5  ;;  %v146_v7 = vpop.xlane.xlu0 %145 }
  0xcb   : > { %v147_v8 = vsel %vm133_vm0, %v146_v7, -inf }
  0xcc   : > { %v140_v9 = vrot.slane %v139_v6, 2  ;;  %v148_v10 = vrot.slane %v147_v8, 4 }
  0xce   : > { %v141_v11 = vmin.f32 %v139_v6, %v140_v9  ;;  %v149_v12 = vmax.f32 %v147_v8, %v148_v10 }
  0xd0   : > { %v142_v13 = vrot.slane %v141_v11, 1  ;;  %v150_v14 = vrot.slane %v149_v12, 2 }
  0xd2   : > { %v143_v15 = vmin.f32 %v141_v11, %v142_v13  ;;  %v151_v16 = vmax.f32 %v149_v12, %v150_v14 }
  0xd4   : > { %v152_v17 = vrot.slane %v151_v16, 1  ;;  %v154_v18 = vmul.f32 255.0, %v143_v15 }
  0xd6   : > { %v153_v19 = vmax.f32 %v151_v16, %v152_v17  ;;  %v155_v21 = vfloor.f32 %v154_v18 }
  0xd8   : > { %v156_v20 = vmul.f32 255.0, %v153_v19 }
  0xda   : > { %v157_v22 = vfloor.f32 %v156_v20 }
  0xdc   : > { %v159_v23 = vsub.f32 %v157_v22, %v155_v21  ;;  %vm158_vm1 = vcmp.gt.f32.partialorder %v157_v22, %v155_v21 }
  0xdd   : > { %v164_v27 = vsel %vm158_vm1, %v155_v21, 0.0 }
  0xde   : > { %v160_v24 = vmax.f32 %v159_v23, 1.0  ;;  %v167_v30 = vsub.f32 %v166_v26, %v164_v27 }
  0xe0   : > { %316 = vrcp.f32 %v160_v24 }
  0xea   : > { %v317_v28 = vpop.eup %316 }
  0xeb   : > { %v162_v29 = vmul.f32 255.0, %v317_v28 }
  0xed   : > { %v163_v31 = vsel %vm158_vm1, %v162_v29, 1.0 }
  0xee   : > { %v168_v32 = vmul.f32 %v167_v30, %v163_v31 }
  0xf0   : > { %v169_v33 = vfloor.f32 %v168_v32 }
  0xf2   : > { %v170_v34 = vmax.f32 %v169_v33, 0.0 }
  0xf4   : > { %v171_v35 = vmin.f32 %v170_v34, 255.0 }
  0xf6   : > { %v172_v36 = vmul.f32 0.003921569, %v171_v35 }
  0xf8   : > { %173 = vst [vmem:[%s131_s25] sm:$0x3] %v172_v36 }
  0xf9   : > { %361 = shalt.err (!%p358_p3)
}
  0xfa   : > { %s362_s5 = scalar_lea.hbm %s548_s29, 32  ;;  %s366_s14 = scalar_lea.hbm %s592_s1, 128 }
  0xfb   : > { %p363_p5 = scmp.ne.s32.totalorder %s548_s29, %s362_s5  ;;  %p367_p13 = scmp.lt.u32.totalorder %s548_s29, %s592_s1 }
  0xfc   : > { %p368_p0 = scmp.lt.u32.totalorder %s366_s14, %s362_s5  ;;  %p370_p6 = scmp.lt.u32.totalorder %s362_s5, %s548_s29 }
  0xfd   : > { %p364_p7 = pnand %p363_p5, %p601_p10 }
  0xfe   : > { %p369_p2 = por %p368_p0, %p367_p13 }
  0xff   : > { %p365_p8 = pneg %p364_p7 }
 0x100   : > { %p371_p11 = por %p370_p6, %p369_p2 }
 0x102   : > { %p372_p12 = pnand %p371_p11, %p365_p8 }
 0x104   : > { %375 = shalt.err (!%p372_p12)
}
 0x105   : > { %272 = dma.vmem_to_hbm [thread:$0]  (%p601_p10), %s550_s26, 32, %s548_s29, %s175_s30  }
 0x106 PF: > { %p283_p4 = scmp.ge.s32.totalorder %s414_s9, 2  ;;  %s200_s21 = sand.u32 1, %s402_s6  }
 0x107   : > { %p602_p9 = scmp.ne.s32.totalorder %s597_s19, 0  ;;  %s201_s22 = scalar_lea.sflag [#allocation4], %s200_s21 }
 0x109   : > { %p279_p1 = pnand %p283_p4, %p602_p9 }
 0x10b   : > { %397 = dma.done.wait (!%p279_p1), %s201_s22, 32  }
 0x10c   : > { %399 = vsyncadd (!%p279_p1), %s201_s22, 4294967264  ;;  %p14_p3 = scmp.ge.s32.totalorder %s453_s12, 6   ;;  %s603_s6 = smov %s406_s7 }
 0x10d   : > { %s604_s7 = smov %s410_s8  ;;  %s605_s8 = smov %s465_s15 }
 0x10e   : > { %s606_s9 = smov %s453_s12  ;;  %16 = sbr.rel (!%p14_p3) target bundleno = 5 (0x5), region = 69 }
 0x115   :  { %206 = vsyncpa [#allocation3], 1 }
 0x116   :  { %208 = vsyncpa [#allocation3 + $0x1], 1 }
 0x117   :  { %209 = vsyncpa [#allocation4], 1 }
 0x118   :  { %211 = vsyncpa [#allocation4 + $0x1], 1 }

</bundles_post_ra>
